<compile_context>
chip_gen: v7x
topology: tpu7x:2x2x1
jax: 0.10.0
libtpu: 0.0.40
codegen_flags: <defaults>
</compile_context>

<pallas_src>
import math
from functools import partial

import jax
import jax.numpy as jnp
from jax import lax
from jax.experimental import pallas as pl
from jax.experimental.pallas import tpu as pltpu

MU = 10.0 * 0.01  # default from the PyTorch module


def _wgan_gp_kernel(alpha_ref, b1_ref, w2_ref, b2_ref,      # small, VMEM-resident
                    real_ref, fake_ref, w1_ref,             # D-tiled streams
                    out_ref,                                # (1,1) scalar in SMEM
                    hr_acc, hf_acc, gram_acc,               # VMEM scratch
                    *, mu):
    k = pl.program_id(0)

    @pl.when(k == 0)
    def _init():
        hr_acc[...] = jnp.zeros_like(hr_acc)
        hf_acc[...] = jnp.zeros_like(hf_acc)
        gram_acc[...] = jnp.zeros_like(gram_acc)

    # One W1 tile (HID, tile_d) in VMEM, reused by all three contractions.
    w1_tile = w1_ref[...]
    dimnums = (((1,), (1,)), ((), ()))  # contract last dims (rhs "transposed")

    # Pre-activations for real / fake (critic first layer), accumulated over D.
    hr_acc[...] += lax.dot_general(real_ref[...], w1_tile, dimnums,
                                   preferred_element_type=jnp.float32)
    hf_acc[...] += lax.dot_general(fake_ref[...], w1_tile, dimnums,
                                   preferred_element_type=jnp.float32)
    # Gram matrix G = W1 @ W1^T accumulated over D tiles; used to evaluate
    # per-sample ||grad||^2 without materializing the (B, D) gradient.
    gram_acc[...] += lax.dot_general(w1_tile, w1_tile, dimnums,
                                     preferred_element_type=jnp.float32)

    @pl.when(k == pl.num_programs(0) - 1)
    def _finalize():
        alpha = alpha_ref[...]          # (B, 1)
        b1 = b1_ref[...]                # (1, HID)
        w2 = w2_ref[...]                # (1, HID)
        b2 = b2_ref[...]                # (1, 1)

        inv_b = 1.0 / hr_acc.shape[0]

        hr = hr_acc[...] + b1                                           # (B, HID)
        hf = hf_acc[...] + b1                                           # (B, HID)
        # Interpolates pre-activation by linearity of x @ W1^T (b1 added once).
        hi = alpha * hr_acc[...] + (1.0 - alpha) * hf_acc[...] + b1     # (B, HID)

        # Critic outputs: second layer has N=1, so use VPU mul + lane-reduce.
        y_real = jnp.sum(jnp.maximum(hr, 0.0) * w2, axis=1, keepdims=True) + b2
        y_fake = jnp.sum(jnp.maximum(hf, 0.0) * w2, axis=1, keepdims=True) + b2

        # d critic / d interp per sample = (relu'(hi) * W2) @ W1.
        # ReLU subgradient at 0 taken as 0 (matches PyTorch).
        g_h = jnp.where(hi > 0.0, w2, 0.0)                              # (B, HID)
        gG = jnp.dot(g_h, gram_acc[...],
                     preferred_element_type=jnp.float32)                # (B, HID)
        sq = jnp.sum(gG * g_h, axis=1, keepdims=True)                   # (B, 1)
        gnorm = jnp.sqrt(sq)
        gp = jnp.sum((gnorm - 1.0) ** 2) * inv_b

        loss = (jnp.sum(y_real) - jnp.sum(y_fake)) * inv_b + mu * gp
        out_ref[0, 0] = loss


@partial(jax.jit, static_argnames=("mu", "tile_d"))
def wgan_gp_loss(alpha, real_nchw, fake_nchw, w1, b1, w2, b2,
                 mu=MU, tile_d=512):
    """w1: (HID, D), b1: (1, HID), w2: (1, HID), b2: (1, 1)  (torch Linear layout)."""
    B = real_nchw.shape[0]
    D = math.prod(real_nchw.shape[1:])
    HID = w1.shape[0]

    real = real_nchw.reshape(B, D).astype(jnp.float32)
    fake = fake_nchw.reshape(B, D).astype(jnp.float32)
    a = alpha.reshape(B, 1).astype(jnp.float32)
    w1 = jnp.asarray(w1, jnp.float32).reshape(HID, D)
    b1 = jnp.asarray(b1, jnp.float32).reshape(1, HID)
    w2 = jnp.asarray(w2, jnp.float32).reshape(1, HID)
    b2 = jnp.asarray(b2, jnp.float32).reshape(1, 1)

    # Lane-aligned D tile; zero-pad D if needed (exact: zero W1 columns and
    # zero real/fake features contribute nothing to h or to the Gram matrix).
    if D >= 128:
        td = max(128, (min(tile_d, D) // 128) * 128)
    else:
        td = D
    d_pad = pl.cdiv(D, td) * td
    if d_pad != D:
        pad = d_pad - D
        real = jnp.pad(real, ((0, 0), (0, pad)))
        fake = jnp.pad(fake, ((0, 0), (0, pad)))
        w1 = jnp.pad(w1, ((0, 0), (0, pad)))
    k_steps = d_pad // td

    vmem_full = pl.BlockSpec(memory_space=pltpu.MemorySpace.VMEM)

    grid_spec = pltpu.PrefetchScalarGridSpec(
        num_scalar_prefetch=0,
        grid=(k_steps,),
        in_specs=[
            vmem_full,                                   # alpha (B, 1)
            vmem_full,                                   # b1    (1, HID)
            vmem_full,                                   # w2    (1, HID)
            vmem_full,                                   # b2    (1, 1)
            pl.BlockSpec((B, td), lambda k: (0, k)),     # real  (B, D)
            pl.BlockSpec((B, td), lambda k: (0, k)),     # fake  (B, D)
            pl.BlockSpec((HID, td), lambda k: (0, k)),   # w1    (HID, D)
        ],
        out_specs=pl.BlockSpec(memory_space=pltpu.MemorySpace.SMEM),
        scratch_shapes=[
            pltpu.VMEM((B, HID), jnp.float32),           # h_real accumulator
            pltpu.VMEM((B, HID), jnp.float32),           # h_fake accumulator
            pltpu.VMEM((HID, HID), jnp.float32),         # Gram accumulator
        ],
    )

    out = pl.pallas_call(
        partial(_wgan_gp_kernel, mu=float(mu)),
        out_shape=jax.ShapeDtypeStruct((1, 1), jnp.float32),
        grid_spec=grid_spec,
        compiler_params=pltpu.CompilerParams(
            dimension_semantics=("arbitrary",)),   # D is a reduction axis
    )(a, b1, w2, b2, real, fake, w1)
    return out[0, 0]


if __name__ == "__main__":
    key = jax.random.PRNGKey(0)
    k_real, k_fake, k_w1, k_b1, k_w2, k_alpha = jax.random.split(key, 6)

    B, C, H, W = 2, 4, 16, 16
    D = C * H * W
    HID = 32

    real = jax.random.normal(k_real, (B, C, H, W), jnp.float32)
    fake = jax.random.normal(k_fake, (B, C, H, W), jnp.float32)

    # Deterministic synthetic critic parameters (torch nn.Linear layout).
    w1 = jax.random.normal(k_w1, (HID, D), jnp.float32) * 0.05
    b1 = jax.random.normal(k_b1, (1, HID), jnp.float32) * 0.05
    w2 = jax.random.normal(k_w2, (1, HID), jnp.float32) * 0.05
    b2 = jnp.zeros((1, 1), jnp.float32)

    # alpha ~ U[0,1) per sample (replaces np.random.random in the torch code).
    alpha = jax.random.uniform(k_alpha, (B, 1, 1, 1), jnp.float32)

    loss = wgan_gp_loss(alpha, real, fake, w1, b1, w2, b2, mu=MU)
    loss = jax.block_until_ready(loss)

    # Pure-JAX reference using autodiff (jax.vjp) to validate the in-kernel
    # closed-form gradient / Gram identity against torch.autograd.grad
    # semantics.
    def critic_ref(x_flat):
        h = jnp.maximum(x_flat @ w1.T + b1, 0.0)
        return h @ w2.T + b2

    interp = (alpha * real + (1.0 - alpha) * fake).reshape(B, D)
    _, vjp_fn = jax.vjp(critic_ref, interp)
    (g,) = vjp_fn(jnp.ones((B, 1), jnp.float32))
    gn = jnp.sqrt(jnp.sum(g ** 2, axis=1))
    ref = (critic_ref(real.reshape(B, D)).mean()
           - critic_ref(fake.reshape(B, D)).mean()
           + MU * ((gn - 1.0) ** 2).mean())
    ref = jax.block_until_ready(ref)

    assert abs(float(loss) - float(ref)) <= 1e-3 * max(1.0, abs(float(ref))), (
        float(loss), float(ref))
    print("KERNEL_OK")
</pallas_src>

<mosaic_0001>
module attributes {stable_mosaic.version = 11 : i64} {
  func.func @_wgan_gp_kernel(%arg0: i32, %arg1: memref<2x1xf32, #tpu.memory_space<vmem>>, %arg2: memref<1x32xf32, #tpu.memory_space<vmem>>, %arg3: memref<1x32xf32, #tpu.memory_space<vmem>>, %arg4: memref<1x1xf32, #tpu.memory_space<vmem>>, %arg5: memref<2x512xf32, #tpu.memory_space<vmem>>, %arg6: memref<2x512xf32, #tpu.memory_space<vmem>>, %arg7: memref<32x512xf32, #tpu.memory_space<vmem>>, %arg8: memref<1x1xf32, #tpu.memory_space<smem>>, %arg9: memref<2x32xf32, #tpu.memory_space<vmem>>, %arg10: memref<2x32xf32, #tpu.memory_space<vmem>>, %arg11: memref<32x32xf32, #tpu.memory_space<vmem>>) attributes {dimension_semantics = [#tpu.dimension_semantics<arbitrary>], iteration_bounds = array<i64: 2>, scalar_prefetch = 0 : i64, scratch_operands = 3 : i64, tpu.core_type = #tpu.core_type<tc>, window_params = [{pipeline_mode = #tpu.pipeline_mode<synchronous>, transform_indices = @transform_0, window_bounds = array<i64: 2, 1>}, {pipeline_mode = #tpu.pipeline_mode<synchronous>, transform_indices = @transform_1, window_bounds = array<i64: 1, 32>}, {pipeline_mode = #tpu.pipeline_mode<synchronous>, transform_indices = @transform_2, window_bounds = array<i64: 1, 32>}, {pipeline_mode = #tpu.pipeline_mode<synchronous>, transform_indices = @transform_3, window_bounds = array<i64: 1, 1>}, {transform_indices = @transform_4, window_bounds = array<i64: 2, 512>}, {transform_indices = @transform_5, window_bounds = array<i64: 2, 512>}, {transform_indices = @transform_6, window_bounds = array<i64: 32, 512>}, {transform_indices = @transform_7, window_bounds = array<i64: 1, 1>}]} {
    %c0_i32 = arith.constant 0 : i32
    %0 = arith.cmpi eq, %arg0, %c0_i32 : i32
    %1 = arith.extui %0 : i1 to i32
    %c0_i32_0 = arith.constant 0 : i32
    %2 = arith.cmpi ne, %1, %c0_i32_0 : i32
    scf.if %2 {
      %cst_21 = arith.constant 0.000000e+00 : f32
      %21 = vector.broadcast %cst_21 : f32 to vector<2x32xf32>
      %c0_22 = arith.constant 0 : index
      %c0_23 = arith.constant 0 : index
      %22 = vector.load %arg9[%c0_22, %c0_23] : memref<2x32xf32, #tpu.memory_space<vmem>>, vector<2x32xf32>
      tpu.vector_store %arg9[%c0_22, %c0_23], %21 {strides = array<i32>} : memref<2x32xf32, #tpu.memory_space<vmem>>, vector<2x32xf32>,
      %cst_24 = arith.constant 0.000000e+00 : f32
      %23 = vector.broadcast %cst_24 : f32 to vector<2x32xf32>
      %c0_25 = arith.constant 0 : index
      %c0_26 = arith.constant 0 : index
      %24 = vector.load %arg10[%c0_25, %c0_26] : memref<2x32xf32, #tpu.memory_space<vmem>>, vector<2x32xf32>
      tpu.vector_store %arg10[%c0_25, %c0_26], %23 {strides = array<i32>} : memref<2x32xf32, #tpu.memory_space<vmem>>, vector<2x32xf32>,
      %cst_27 = arith.constant 0.000000e+00 : f32
      %25 = vector.broadcast %cst_27 : f32 to vector<32x32xf32>
      %c0_28 = arith.constant 0 : index
      %c0_29 = arith.constant 0 : index
      %26 = vector.load %arg11[%c0_28, %c0_29] : memref<32x32xf32, #tpu.memory_space<vmem>>, vector<32x32xf32>
      tpu.vector_store %arg11[%c0_28, %c0_29], %25 {strides = array<i32>} : memref<32x32xf32, #tpu.memory_space<vmem>>, vector<32x32xf32>,
    } else {
    }
    %c0 = arith.constant 0 : index
    %c0_1 = arith.constant 0 : index
    %3 = vector.load %arg7[%c0, %c0_1] : memref<32x512xf32, #tpu.memory_space<vmem>>, vector<32x512xf32>
    %c0_2 = arith.constant 0 : index
    %c0_3 = arith.constant 0 : index
    %4 = vector.load %arg9[%c0_2, %c0_3] : memref<2x32xf32, #tpu.memory_space<vmem>>, vector<2x32xf32>
    %c0_4 = arith.constant 0 : index
    %c0_5 = arith.constant 0 : index
    %5 = vector.load %arg5[%c0_4, %c0_5] : memref<2x512xf32, #tpu.memory_space<vmem>>, vector<2x512xf32>
    %cst = arith.constant dense<0.000000e+00> : vector<2x32xf32>
    %6 = tpu.matmul %5, %3, %cst {dimension_numbers = #tpu.dot_dimension_numbers<[1], [1], [0], [0], [0, 0, 1, 0], [], []>} : vector<2x512xf32>, vector<32x512xf32>, vector<2x32xf32> -> vector<2x32xf32>
    %7 = arith.addf %4, %6 : vector<2x32xf32>
    %c0_6 = arith.constant 0 : index
    %c0_7 = arith.constant 0 : index
    %8 = vector.load %arg9[%c0_6, %c0_7] : memref<2x32xf32, #tpu.memory_space<vmem>>, vector<2x32xf32>
    tpu.vector_store %arg9[%c0_6, %c0_7], %7 {strides = array<i32>} : memref<2x32xf32, #tpu.memory_space<vmem>>, vector<2x32xf32>,
    %c0_8 = arith.constant 0 : index
    %c0_9 = arith.constant 0 : index
    %9 = vector.load %arg10[%c0_8, %c0_9] : memref<2x32xf32, #tpu.memory_space<vmem>>, vector<2x32xf32>
    %c0_10 = arith.constant 0 : index
    %c0_11 = arith.constant 0 : index
    %10 = vector.load %arg6[%c0_10, %c0_11] : memref<2x512xf32, #tpu.memory_space<vmem>>, vector<2x512xf32>
    %cst_12 = arith.constant dense<0.000000e+00> : vector<2x32xf32>
    %11 = tpu.matmul %10, %3, %cst_12 {dimension_numbers = #tpu.dot_dimension_numbers<[1], [1], [0], [0], [0, 0, 1, 0], [], []>} : vector<2x512xf32>, vector<32x512xf32>, vector<2x32xf32> -> vector<2x32xf32>
    %12 = arith.addf %9, %11 : vector<2x32xf32>
    %c0_13 = arith.constant 0 : index
    %c0_14 = arith.constant 0 : index
    %13 = vector.load %arg10[%c0_13, %c0_14] : memref<2x32xf32, #tpu.memory_space<vmem>>, vector<2x32xf32>
    tpu.vector_store %arg10[%c0_13, %c0_14], %12 {strides = array<i32>} : memref<2x32xf32, #tpu.memory_space<vmem>>, vector<2x32xf32>,
    %c0_15 = arith.constant 0 : index
    %c0_16 = arith.constant 0 : index
    %14 = vector.load %arg11[%c0_15, %c0_16] : memref<32x32xf32, #tpu.memory_space<vmem>>, vector<32x32xf32>
    %cst_17 = arith.constant dense<0.000000e+00> : vector<32x32xf32>
    %15 = tpu.matmul %3, %3, %cst_17 {dimension_numbers = #tpu.dot_dimension_numbers<[1], [1], [0], [0], [0, 0, 1, 0], [], []>} : vector<32x512xf32>, vector<32x512xf32>, vector<32x32xf32> -> vector<32x32xf32>
    %16 = arith.addf %14, %15 : vector<32x32xf32>
    %c0_18 = arith.constant 0 : index
    %c0_19 = arith.constant 0 : index
    %17 = vector.load %arg11[%c0_18, %c0_19] : memref<32x32xf32, #tpu.memory_space<vmem>>, vector<32x32xf32>
    tpu.vector_store %arg11[%c0_18, %c0_19], %16 {strides = array<i32>} : memref<32x32xf32, #tpu.memory_space<vmem>>, vector<32x32xf32>,
    %c1_i32 = arith.constant 1 : i32
    %18 = arith.cmpi eq, %arg0, %c1_i32 : i32
    %19 = arith.extui %18 : i1 to i32
    %c0_i32_20 = arith.constant 0 : i32
    %20 = arith.cmpi ne, %19, %c0_i32_20 : i32
    scf.if %20 {
      %c0_21 = arith.constant 0 : index
      %c0_22 = arith.constant 0 : index
      %21 = vector.load %arg1[%c0_21, %c0_22] : memref<2x1xf32, #tpu.memory_space<vmem>>, vector<2x1xf32>
      %c0_23 = arith.constant 0 : index
      %c0_24 = arith.constant 0 : index
      %22 = vector.load %arg2[%c0_23, %c0_24] : memref<1x32xf32, #tpu.memory_space<vmem>>, vector<1x32xf32>
      %c0_25 = arith.constant 0 : index
      %c0_26 = arith.constant 0 : index
      %23 = vector.load %arg3[%c0_25, %c0_26] : memref<1x32xf32, #tpu.memory_space<vmem>>, vector<1x32xf32>
      %c0_27 = arith.constant 0 : index
      %c0_28 = arith.constant 0 : index
      %24 = vector.load %arg4[%c0_27, %c0_28] : memref<1x1xf32, #tpu.memory_space<vmem>>, vector<1x1xf32>
      %c0_29 = arith.constant 0 : index
      %c0_30 = arith.constant 0 : index
      %25 = vector.load %arg9[%c0_29, %c0_30] : memref<2x32xf32, #tpu.memory_space<vmem>>, vector<2x32xf32>
      %26 = vector.broadcast %22 : vector<1x32xf32> to vector<2x32xf32>
      %27 = arith.addf %25, %26 : vector<2x32xf32>
      %c0_31 = arith.constant 0 : index
      %c0_32 = arith.constant 0 : index
      %28 = vector.load %arg10[%c0_31, %c0_32] : memref<2x32xf32, #tpu.memory_space<vmem>>, vector<2x32xf32>
      %29 = vector.broadcast %22 : vector<1x32xf32> to vector<2x32xf32>
      %30 = arith.addf %28, %29 : vector<2x32xf32>
      %c0_33 = arith.constant 0 : index
      %c0_34 = arith.constant 0 : index
      %31 = vector.load %arg9[%c0_33, %c0_34] : memref<2x32xf32, #tpu.memory_space<vmem>>, vector<2x32xf32>
      %32 = vector.broadcast %21 : vector<2x1xf32> to vector<2x32xf32>
      %33 = arith.mulf %32, %31 : vector<2x32xf32>
      %cst_35 = arith.constant 1.000000e+00 : f32
      %34 = vector.broadcast %cst_35 : f32 to vector<2x1xf32>
      %35 = arith.subf %34, %21 : vector<2x1xf32>
      %c0_36 = arith.constant 0 : index
      %c0_37 = arith.constant 0 : index
      %36 = vector.load %arg10[%c0_36, %c0_37] : memref<2x32xf32, #tpu.memory_space<vmem>>, vector<2x32xf32>
      %37 = vector.broadcast %35 : vector<2x1xf32> to vector<2x32xf32>
      %38 = arith.mulf %37, %36 : vector<2x32xf32>
      %39 = arith.addf %33, %38 : vector<2x32xf32>
      %40 = vector.broadcast %22 : vector<1x32xf32> to vector<2x32xf32>
      %41 = arith.addf %39, %40 : vector<2x32xf32>
      %cst_38 = arith.constant 0.000000e+00 : f32
      %42 = vector.broadcast %cst_38 : f32 to vector<2x32xf32>
      %43 = arith.maximumf %27, %42 : vector<2x32xf32>
      %44 = vector.broadcast %23 : vector<1x32xf32> to vector<2x32xf32>
      %45 = arith.mulf %43, %44 : vector<2x32xf32>
      %cst_39 = arith.constant dense<0.000000e+00> : vector<2xf32>
      %46 = vector.multi_reduction <add>, %45, %cst_39 [1] : vector<2x32xf32> to vector<2xf32>
      %47 = vector.shape_cast %46 : vector<2xf32> to vector<2x1xf32>
      %48 = vector.broadcast %24 : vector<1x1xf32> to vector<2x1xf32>
      %49 = arith.addf %47, %48 : vector<2x1xf32>
      %cst_40 = arith.constant 0.000000e+00 : f32
      %50 = vector.broadcast %cst_40 : f32 to vector<2x32xf32>
      %51 = arith.maximumf %30, %50 : vector<2x32xf32>
      %52 = vector.broadcast %23 : vector<1x32xf32> to vector<2x32xf32>
      %53 = arith.mulf %51, %52 : vector<2x32xf32>
      %cst_41 = arith.constant dense<0.000000e+00> : vector<2xf32>
      %54 = vector.multi_reduction <add>, %53, %cst_41 [1] : vector<2x32xf32> to vector<2xf32>
      %55 = vector.shape_cast %54 : vector<2xf32> to vector<2x1xf32>
      %56 = vector.broadcast %24 : vector<1x1xf32> to vector<2x1xf32>
      %57 = arith.addf %55, %56 : vector<2x1xf32>
      %cst_42 = arith.constant 0.000000e+00 : f32
      %58 = vector.broadcast %cst_42 : f32 to vector<2x32xf32>
      %59 = arith.cmpf ogt, %41, %58 : vector<2x32xf32>
      %cst_43 = arith.constant 0.000000e+00 : f32
      %60 = vector.shape_cast %23 : vector<1x32xf32> to vector<1x32xf32>
      %61 = vector.broadcast %60 : vector<1x32xf32> to vector<2x32xf32>
      %62 = vector.broadcast %cst_43 : f32 to vector<2x32xf32>
      %63 = arith.select %59, %61, %62 : vector<2x32xi1>, vector<2x32xf32>
      %c0_44 = arith.constant 0 : index
      %c0_45 = arith.constant 0 : index
      %64 = vector.load %arg11[%c0_44, %c0_45] : memref<32x32xf32, #tpu.memory_space<vmem>>, vector<32x32xf32>
      %cst_46 = arith.constant dense<0.000000e+00> : vector<2x32xf32>
      %65 = tpu.matmul %63, %64, %cst_46 {dimension_numbers = #tpu.dot_dimension_numbers<[1], [0], [0], [1], [0, 0, 1, 1], [], []>} : vector<2x32xf32>, vector<32x32xf32>, vector<2x32xf32> -> vector<2x32xf32>
      %66 = arith.mulf %65, %63 : vector<2x32xf32>
      %cst_47 = arith.constant dense<0.000000e+00> : vector<2xf32>
      %67 = vector.multi_reduction <add>, %66, %cst_47 [1] : vector<2x32xf32> to vector<2xf32>
      %68 = vector.shape_cast %67 : vector<2xf32> to vector<2x1xf32>
      %69 = math.sqrt %68 : vector<2x1xf32>
      %cst_48 = arith.constant 1.000000e+00 : f32
      %70 = vector.broadcast %cst_48 : f32 to vector<2x1xf32>
      %71 = arith.subf %69, %70 : vector<2x1xf32>
      %72 = arith.mulf %71, %71 : vector<2x1xf32>
      %73 = vector.shape_cast %72 : vector<2x1xf32> to vector<1x2x1xf32>
      %cst_49 = arith.constant dense<0.000000e+00> : vector<1xf32>
      %74 = vector.multi_reduction <add>, %73, %cst_49 [1, 2] : vector<1x2x1xf32> to vector<1xf32>
      %75 = vector.shape_cast %74 : vector<1xf32> to vector<1x1x1xf32>
      %76 = vector.extract %75[0, 0, 0] : f32 from vector<1x1x1xf32>
      %cst_50 = arith.constant 5.000000e-01 : f32
      %77 = arith.mulf %76, %cst_50 : f32
      %78 = vector.shape_cast %49 : vector<2x1xf32> to vector<1x2x1xf32>
      %cst_51 = arith.constant dense<0.000000e+00> : vector<1xf32>
      %79 = vector.multi_reduction <add>, %78, %cst_51 [1, 2] : vector<1x2x1xf32> to vector<1xf32>
      %80 = vector.shape_cast %79 : vector<1xf32> to vector<1x1x1xf32>
      %81 = vector.extract %80[0, 0, 0] : f32 from vector<1x1x1xf32>
      %82 = vector.shape_cast %57 : vector<2x1xf32> to vector<1x2x1xf32>
      %cst_52 = arith.constant dense<0.000000e+00> : vector<1xf32>
      %83 = vector.multi_reduction <add>, %82, %cst_52 [1, 2] : vector<1x2x1xf32> to vector<1xf32>
      %84 = vector.shape_cast %83 : vector<1xf32> to vector<1x1x1xf32>
      %85 = vector.extract %84[0, 0, 0] : f32 from vector<1x1x1xf32>
      %86 = arith.subf %81, %85 : f32
      %cst_53 = arith.constant 5.000000e-01 : f32
      %87 = arith.mulf %86, %cst_53 : f32
      %cst_54 = arith.constant 1.000000e-01 : f32
      %88 = arith.mulf %cst_54, %77 : f32
      %89 = arith.addf %87, %88 : f32
      %c0_55 = arith.constant 0 : index
      %c0_56 = arith.constant 0 : index
      %90 = memref.load %arg8[%c0_55, %c0_56] : memref<1x1xf32, #tpu.memory_space<smem>>
      memref.store %89, %arg8[%c0_55, %c0_56] : memref<1x1xf32, #tpu.memory_space<smem>>
    } else {
    }
    return
  }
  func.func @transform_0(%arg0: i32) -> (i32, i32) {
    %c0_i32 = arith.constant 0 : i32
    %c0_i32_0 = arith.constant 0 : i32
    %c0_i32_1 = arith.constant 0 : i32
    return %c0_i32, %c0_i32_0 : i32, i32
  }
  func.func @transform_1(%arg0: i32) -> (i32, i32) {
    %c0_i32 = arith.constant 0 : i32
    %c0_i32_0 = arith.constant 0 : i32
    %c0_i32_1 = arith.constant 0 : i32
    return %c0_i32, %c0_i32_0 : i32, i32
  }
  func.func @transform_2(%arg0: i32) -> (i32, i32) {
    %c0_i32 = arith.constant 0 : i32
    %c0_i32_0 = arith.constant 0 : i32
    %c0_i32_1 = arith.constant 0 : i32
    return %c0_i32, %c0_i32_0 : i32, i32
  }
  func.func @transform_3(%arg0: i32) -> (i32, i32) {
    %c0_i32 = arith.constant 0 : i32
    %c0_i32_0 = arith.constant 0 : i32
    %c0_i32_1 = arith.constant 0 : i32
    return %c0_i32, %c0_i32_0 : i32, i32
  }
  func.func @transform_4(%arg0: i32) -> (i32, i32) {
    %c0_i32 = arith.constant 0 : i32
    %c0_i32_0 = arith.constant 0 : i32
    return %c0_i32, %arg0 : i32, i32
  }
  func.func @transform_5(%arg0: i32) -> (i32, i32) {
    %c0_i32 = arith.constant 0 : i32
    %c0_i32_0 = arith.constant 0 : i32
    return %c0_i32, %arg0 : i32, i32
  }
  func.func @transform_6(%arg0: i32) -> (i32, i32) {
    %c0_i32 = arith.constant 0 : i32
    %c0_i32_0 = arith.constant 0 : i32
    return %c0_i32, %arg0 : i32, i32
  }
  func.func @transform_7(%arg0: i32) -> (i32, i32) {
    %c0_i32 = arith.constant 0 : i32
    %c0_i32_0 = arith.constant 0 : i32
    %c0_i32_1 = arith.constant 0 : i32
    return %c0_i32, %c0_i32_0 : i32, i32
  }
}

</mosaic_0001>

<bundles_post_ra>
// kernel: wgan_gp_loss.1
= control target key start
LH: loop header
LB: loop body
LE: loop exit
PB: predicated region body
PF: predicated region fallthrough
CT: control target
= control target key end

     0   :  { %s1583_s0 = inlined_call_operand.vmem [shape: f32[2,1], index: 0, kind: input, shape index: {}]   ;;  %s1584_s1 = inlined_call_operand.vmem [shape: f32[1,32], index: 1, kind: input, shape index: {}]   ;;  %s1585_s2 = inlined_call_operand.vmem [shape: f32[1,32], index: 2, kind: input, shape index: {}]   ;;  %s1586_s3 = inlined_call_operand.<no memory space> [shape: f32[1,1], index: 3, kind: input, shape index: {}]   ;;  %s1587_s4 = inlined_call_operand.vmem [shape: f32[2,1024], index: 4, kind: input, shape index: {}]   ;;  %s1588_s5 = inlined_call_operand.vmem [shape: f32[2,1024], index: 5, kind: input, shape index: {}]   ;;  %s1589_s6 = inlined_call_operand.vmem [shape: f32[32,1024], index: 6, kind: input, shape index: {}]   ;;  %s1590_s7 = inlined_call_operand.hbm [shape: f32[1,1], index: 7, kind: output, shape index: {}]  }
   0x1   :  { %v12_v0 = vstv %s1586_s3 }
   0x2   :  { %13 = vst [vmem:[#allocation5] sm:$0x1] %v12_v0 }
   0x3   :  { %14 = vsyncpa [#allocation8], 0  ;;  %s1400_s26 = smov 0   ;;  %s1402_s27 = smov 0  }
   0x4   :  { %s1404_s28 = smov 0  }
   0x5 LB: > { %s1416_s3 = sadd.s32 4294967295, %s1348_s28   ;;  %s1419_s29 = sadd.s32 1, %s1348_s28   ;;  %s1348_s28 = sphi %s1404_s28, %s1593_s28   ;;  %s1344_s27 = sphi %s1402_s27, %s1592_s27   ;;  %s1340_s26 = sphi %s1400_s26, %s1591_s26  }
   0x6   : > { %s160_s30 = ssub.s32 %s1348_s28, %s1419_s29  ;;  %s163_s8 = sadd.s32 1, %s1344_s27 }
   0x7   : > { %p161_p0 = scmp.eq.s32.totalorder %s160_s30, 0  ;;  %p170_p1 = scmp.ne.s32.totalorder %s1344_s27, %s1340_s26 }
   0x8   : > { %p171_p2 = scmp.eq.s32.totalorder %s1348_s28, 0  ;;  %p1170_p4 = scmp.ge.s32.totalorder %s1348_s28, 2 }
   0x9   : > { %s1428_s9 = scalar_select %p161_p0, %s1344_s27, %s163_s8  }
   0xa   : > { %p172_p3 = por %p171_p2, %p170_p1  ;;  %229 = sbr.rel (%p1170_p4) target bundleno = 29 (0x1d), region = 32 }
  0x11   : > { %250 = sbr.rel (!%p172_p3) target bundleno = 29 (0x1d), region = 44  ;;  %s252_s10 = sand.u32 (%p172_p3), 1, %s1344_s27  }
  0x12   : > { %s1191_s11 = sshll.u32 (%p172_p3), %s1348_s28, 5  ;;  %s1171_s12 = sshll.u32 (%p172_p3), %s252_s10, 7 }
  0x13   : > { %s1436_s15 = scalar_lea.vmem (%p172_p3), %s1589_s6, %s1191_s11  ;;  %s254_s16 = scalar_lea.vmem (%p172_p3), [#allocation6], %s1171_s12 }
  0x14   : > { %v270_v1 = vld [vmem:[%s1436_s15] sm:$0xff] (%p172_p3)  ;;  %v272_v2 = vld [vmem:[%s1436_s15 + $0x8] sm:$0xff] (%p172_p3)  ;;  %v274_v3 = vld [vmem:[%s1436_s15 + $0x10] sm:$0xff] (%p172_p3) }
  0x15   : > { %271 = vst [vmem:[%s254_s16] sm:$0xff] (%p172_p3), %v270_v1  ;;  %273 = vst [vmem:[%s254_s16 + $0x8] sm:$0xff] (%p172_p3), %v272_v2  ;;  %v276_v4 = vld [vmem:[%s1436_s15 + $0x18] sm:$0xff] (%p172_p3)  ;;  %v278_v5 = vld [vmem:[%s1436_s15 + $0x40] sm:$0xff] (%p172_p3) }
  0x16   : > { %275 = vst [vmem:[%s254_s16 + $0x10] sm:$0xff] (%p172_p3), %v274_v3  ;;  %v280_v6 = vld [vmem:[%s1436_s15 + $0x48] sm:$0xff] (%p172_p3)  ;;  %277 = vst [vmem:[%s254_s16 + $0x18] sm:$0xff] (%p172_p3), %v276_v4  ;;  %v282_v7 = vld [vmem:[%s1436_s15 + $0x50] sm:$0xff] (%p172_p3) }
  0x17   : > { %279 = vst [vmem:[%s254_s16 + $0x20] sm:$0xff] (%p172_p3), %v278_v5  ;;  %281 = vst [vmem:[%s254_s16 + $0x28] sm:$0xff] (%p172_p3), %v280_v6  ;;  %v284_v8 = vld [vmem:[%s1436_s15 + $0x58] sm:$0xff] (%p172_p3)  ;;  %v286_v9 = vld [vmem:[%s1436_s15 + $0x80] sm:$0xff] (%p172_p3) }
  0x18   : > { %283 = vst [vmem:[%s254_s16 + $0x30] sm:$0xff] %v282_v7  ;;  %285 = vst [vmem:[%s254_s16 + $0x38] sm:$0xff] %v284_v8  ;;  %v288_v10 = vld [vmem:[%s1436_s15 + $0x88] sm:$0xff]  ;;  %v290_v11 = vld [vmem:[%s1436_s15 + $0x90] sm:$0xff] }
  0x19   : > { %287 = vst [vmem:[%s254_s16 + $0x40] sm:$0xff] %v286_v9  ;;  %v292_v12 = vld [vmem:[%s1436_s15 + $0x98] sm:$0xff]  ;;  %289 = vst [vmem:[%s254_s16 + $0x48] sm:$0xff] %v288_v10  ;;  %v294_v13 = vld [vmem:[%s1436_s15 + $0xc0] sm:$0xff] }
  0x1a   : > { %291 = vst [vmem:[%s254_s16 + $0x50] sm:$0xff] %v290_v11  ;;  %293 = vst [vmem:[%s254_s16 + $0x58] sm:$0xff] %v292_v12  ;;  %v296_v14 = vld [vmem:[%s1436_s15 + $0xc8] sm:$0xff]  ;;  %v298_v15 = vld [vmem:[%s1436_s15 + $0xd0] sm:$0xff] }
  0x1b   : > { %295 = vst [vmem:[%s254_s16 + $0x60] sm:$0xff] %v294_v13  ;;  %297 = vst [vmem:[%s254_s16 + $0x68] sm:$0xff] %v296_v14  ;;  %v300_v16 = vld [vmem:[%s1436_s15 + $0xd8] sm:$0xff] }
  0x1c   : > { %299 = vst [vmem:[%s254_s16 + $0x70] sm:$0xff] %v298_v15  ;;  %301 = vst [vmem:[%s254_s16 + $0x78] sm:$0xff] %v300_v16 }
  0x1d PF: > { %p1174_p5 = scmp.ge.s32.totalorder %s1348_s28, 1  ;;  %p306_p6 = scmp.lt.s32.totalorder %s1348_s28, 3 }
  0x1f   : > { %p307_p7 = pnand %p1174_p5, %p306_p6 }
  0x20   : > { %s313_s17 = sand.u32 (!%p307_p7), 1, %s1340_s26   ;;  %s1176_s18 = sshll.u32 (!%p307_p7), %s1416_s3, 2 }
  0x21   : > { %310 = sbr.rel (%p307_p7) target bundleno = 948 (0x3b4), region = 67  ;;  %s1175_s19 = sshll.u32 (!%p307_p7), %s313_s17, 7 }
  0x22   : > { %p350_p8 = scmp.lt.s32.totalorder (!%p307_p7), %s1176_s18, 7  ;;  %s1468_s28 = scalar_lea.vmem (!%p307_p7), [#allocation6], %s1175_s19 }
  0x23   : > { %p1180_p9 = scmp.ne.s32.totalorder (!%p307_p7), %s1416_s3, 0 }
  0x28   : > { %s1595_s18 = smov (!%p350_p8, %s1176_s18), 7  ;;  %365 = sbr.rel (%p1180_p9) target bundleno = 47 (0x2f), region = 75 }
  0x29   : > { %s1177_s20 = sshll.u32 %s1595_s18, 1  ;;  %vm366_vm0 = vcmask (!%p1180_p9), 254976   ;;  %vm369_vm1 = vcmask (!%p1180_p9), 261120   ;;  %v1350_v17 = vmov (!%p1180_p9), 0.0  }
  0x2a   : > { %s1461_s23 = scalar_lea.vmem %s1587_s4, %s1177_s20  ;;  %s1466_s30 = scalar_lea.vmem %s1588_s5, %s1177_s20  ;;  %367 = vst.msk [vmem:[#allocation2] sm:$0x3] (!%p1180_p9), %vm366_vm0, %v1350_v17  ;;  %368 = vst.msk [vmem:[#allocation3] sm:$0x3] (!%p1180_p9), %vm366_vm0, %v1350_v17 }
  0x2b   : > { %370 = vst.msk [vmem:[#allocation4] sm:$0xff] (!%p1180_p9), %vm369_vm1, %v1350_v17  ;;  %371 = vst.msk [vmem:[#allocation4 + $0x8] sm:$0xff] (!%p1180_p9), %vm369_vm1, %v1350_v17 }
  0x2c   : > { %372 = vst.msk [vmem:[#allocation4 + $0x10] sm:$0xff] (!%p1180_p9), %vm369_vm1, %v1350_v17  ;;  %373 = vst.msk [vmem:[#allocation4 + $0x18] sm:$0xff] (!%p1180_p9), %vm369_vm1, %v1350_v17 }
  0x2f PF: > { %v1472_v18 = vld [vmem:[%s1468_s28 + $0x8] sm:$0xff]  ;;  %v1478_v20 = vld [vmem:[%s1468_s28 + $0x18] sm:$0xff]  ;;  %v397_v21 = vlaneseq  ;;  %v1486_v24 = vld [vmem:[%s1468_s28] sm:$0xff]  ;;  %v1351_v26 = vmov 1983009808   ;;  %vm555_vm2 = vcmask 254976  }
  0x30   : > { %v1475_v19 = vld [vmem:[%s1468_s28 + $0x28] sm:$0xff]  ;;  %v1483_v23 = vld [vmem:[%s1468_s28 + $0x38] sm:$0xff]  ;;  %v1489_v25 = vld [vmem:[%s1468_s28 + $0x20] sm:$0xff]  ;;  %v395_v27 = vunpack.c.l.s4 %v1351_v26  ;;  %vm901_vm3 = vcmask 261120   ;;  %p1181_p10 = scmp.ne.s32.totalorder %s1416_s3, 1 }
  0x31   : > { %v1208_v22 = vpack.c.bf16 %v1475_v19, %v1472_v18  ;;  %v1216_v28 = vpack.c.bf16 %v1483_v23, %v1478_v20  ;;  %v1210_v29 = vpack.c.bf16 %v1489_v25, %v1486_v24  ;;  %v1496_v30 = vld [vmem:[%s1468_s28 + $0x10] sm:$0xff]  ;;  %v1502_v32 = vld [vmem:[%s1468_s28 + $0x48] sm:$0xff]  ;;  %v398_v33 = vshrl.u32 %v397_v21, 7  ;;  %v1510_v36 = vld [vmem:[%s1468_s28 + $0x58] sm:$0xff] }
  0x32   : > { %v1499_v31 = vld [vmem:[%s1468_s28 + $0x30] sm:$0xff]  ;;  %v1507_v35 = vld [vmem:[%s1468_s28 + $0x68] sm:$0xff]  ;;  %v1513_v37 = vld [vmem:[%s1468_s28 + $0x78] sm:$0xff]  ;;  %v396_v38 = vunpack.c.0.s8 %v395_v27  ;;  %vm1354_vm4 = vmmov (!%p1181_p10), 0   ;;  %vm1055_vm6 = vcmask (!%p1181_p10), 1024  }
  0x33   : > { %1209 = vmatprep.subr.bf16.mxu0 %v1208_v22  ;;  %v1218_v34 = vpack.c.bf16 %v1499_v31, %v1496_v30  ;;  %1217 = vmatprep.subr.bf16.mxu1 %v1216_v28  ;;  %v1212_v39 = vpack.c.bf16 %v1507_v35, %v1502_v32  ;;  %v1220_v40 = vpack.c.bf16 %v1513_v37, %v1510_v36  ;;  %v382_v41 = vld [vmem:[%s1468_s28 + $0x40] sm:$0xff]  ;;  %v384_v45 = vld [vmem:[%s1468_s28 + $0x50] sm:$0xff]  ;;  %v390_v61 = vld [vmem:[#allocation2] sm:$0x3] }
  0x34   : > { %1211 = vmatpush1.bf16.xpose.msra.mxu0 %v1210_v29  ;;  %v386_v42 = vld [vmem:[%s1468_s28 + $0x60] sm:$0xff]  ;;  %v399_v44 = vsub.s32 %v396_v38, %v398_v33  ;;  %v388_v46 = vld [vmem:[%s1468_s28 + $0x70] sm:$0xff]  ;;  %v557_v4 = vld [vmem:[#allocation3] sm:$0x3] }
  0x35   : > { %1219 = vmatpush1.bf16.xpose.msra.mxu1 %v1218_v34  ;;  %v391_v43 = vld [vmem:[%s1461_s23] sm:$0xff]  ;;  %1213 = vmatprep.subr.bf16.mxu0 %v1212_v39  ;;  %v1214_v49 = vpack.c.bf16 %v386_v42, %v382_v41  ;;  %v1222_v52 = vpack.c.bf16 %v388_v46, %v384_v45 }
  0x36   : > { %1221 = vmatprep.subr.bf16.mxu1 %v1220_v40  ;;  %v393_v47 = vcombine.high %v391_v43, %v391_v43  ;;  %v400_v48 = vrot.slane %v391_v43, %v399_v44  ;;  %v558_v51 = vld [vmem:[%s1466_s30] sm:$0xff] }
  0x37   : > { %v560_v55 = vcombine.high %v558_v51, %v558_v51  ;;  %v567_v56 = vrot.slane %v558_v51, %v399_v44  ;;  %v723_v11 = vld [vmem:[#allocation4] sm:$0xff]  ;;  %v910_v38 = vld [vmem:[%s1583_s0] sm:$0x3] (!%p1181_p10) }
  0x38   : > { %v407_v50 = vrot.slane %v393_v47, %v399_v44  ;;  %v408_v53 = vcombine.high %v400_v48, %v400_v48 }
  0x39   : > { %v574_v57 = vrot.slane %v560_v55, %v399_v44  ;;  %v575_v58 = vcombine.high %v567_v56, %v567_v56  ;;  %v1353_v44 = vmov (!%p1181_p10), 0.0|0.0   ;;  %v1182_v55 = vld [vmem:[%s1584_s1] ss:$0 sm:$0xff] (!%p1181_p10) }
  0x3a   : > { %v409_v54 = vcombine.high %v407_v50, %v407_v50  ;;  %478 = vmatprep.mubr.f32.mxu0 %v408_v53 }
  0x3b   : > { %v576_v59 = vcombine.high %v574_v57, %v574_v57 }
  0x3c   : > { %1215 = vmatpush1.bf16.xpose.msra.mxu0 %v1214_v49  ;;  %548 = vmatprep.mubr.f32.mxu1 %v409_v54 }
  0x3d   : > { %1223 = vmatpush1.bf16.xpose.msra.mxu1 %v1222_v52  ;;  %1225 = vmatprep.subr.bf16.mxu0 %v1208_v22 }
  0x3e   : > { %1233 = vmatprep.subr.bf16.mxu1 %v1216_v28 }
  0x43   : > { %479 = vmatmul.mubr.f32.vlgmr.msra.gmra.mrb[0].mxu0 %v400_v48  ;;  %v1355_v48 = vmov (!%p1181_p10), 0.0  }
  0x44   : > { %549 = vmatmul.mubr.f32.vlgmr.msra.gmra.mrb[0].mxu1 %v407_v50  ;;  %1227 = vmatpush1.bf16.xpose.msra.mxu0 %v1210_v29 }
  0x45   : > { %1235 = vmatpush1.bf16.xpose.msra.mxu1 %v1218_v34  ;;  %1229 = vmatprep.subr.bf16.mxu0 %v1212_v39 }
  0x46   : > { %1237 = vmatprep.subr.bf16.mxu1 %v1220_v40  ;;  %645 = vmatprep.mubr.f32.mxu0 %v575_v58 }
  0x47   : > { %715 = vmatprep.mubr.f32.mxu1 %v576_v59 }
  0x4c   : > { %1231 = vmatpush1.bf16.xpose.msra.mxu0 %v1214_v49 }
  0x4d   : > { %1239 = vmatpush1.bf16.xpose.msra.mxu1 %v1222_v52  ;;  %1241 = vmatprep.subr.bf16.mxu0 %v1208_v22 }
  0x4e   : > { %1249 = vmatprep.subr.bf16.mxu1 %v1216_v28 }
  0x53   : > { %646 = vmatmul.mubr.f32.vlgmr.msra.gmra.mrb[2].mxu0 %v567_v56 }
  0x54   : > { %716 = vmatmul.mubr.f32.vlgmr.msra.gmra.mrb[2].mxu1 %v574_v57  ;;  %1243 = vmatpush1.bf16.xpose.msra.mxu0 %v1210_v29  ;;  %v1183_v57 = vld [vmem:[%s1585_s2] ss:$0 sm:$0xff] (!%p1181_p10) }
  0x55   : > { %1251 = vmatpush1.bf16.xpose.msra.mxu1 %v1218_v34  ;;  %1245 = vmatprep.subr.bf16.mxu0 %v1212_v39  ;;  %v1352_v39 = vmov (!%p1181_p10), 0  }
  0x56   : > { %1253 = vmatprep.subr.bf16.mxu1 %v1220_v40  ;;  %791 = vmatprep.mubr.f32.mxu0 %v1472_v18  ;;  %v724_v18 = vld [vmem:[#allocation4 + $0x8] sm:$0xff]  ;;  %v930_v40 = vsub.f32 (!%p1181_p10), 1.0, %v910_v38 }
  0x57   : > { %876 = vmatprep.mubr.f32.mxu1 %v1478_v20  ;;  %1307 = vset.pattern.permute.xlu0 (!%p1181_p10), %v1352_v39 }
  0x58   : > { %926 = vperm.xlu0 (!%p1181_p10), %1307, %v910_v38  }
  0x5c   : > { %1247 = vmatpush1.bf16.xpose.msra.mxu0 %v1214_v49  ;;  %933 = vperm.xlu0 (!%p1181_p10), %1307, %v930_v40  }
  0x5d   : > { %1255 = vmatpush1.bf16.xpose.msra.mxu1 %v1222_v52  ;;  %1256 = vmatprep.subr.bf16.mxu0 (!%p1181_p10), %v1353_v44 }
  0x63   : > { %792 = vmatmul.mubr.f32.vlgmr.msra.gmra.mrb[4].mxu0 %v1486_v24 }
  0x64   : > { %877 = vmatmul.mubr.f32.vlgmr.msra.gmra.mrb[4].mxu1 %v1496_v30  ;;  %796 = vmatprep.mubr.f32.mxu0 %v1475_v19 }
  0x65   : > { %881 = vmatprep.mubr.f32.mxu1 %v1483_v23 }
  0x67   : > { %797 = vmatmul.mubr.f32.gmra.mrb[6].mxu0 %v1489_v25  ;;  %v725_v25 = vld [vmem:[#allocation4 + $0x10] sm:$0xff] }
  0x68   : > { %882 = vmatmul.mubr.f32.gmra.mrb[6].mxu1 %v1499_v31  ;;  %801 = vmatprep.mubr.f32.mxu0 %v1502_v32  ;;  %v726_v32 = vld [vmem:[#allocation4 + $0x18] sm:$0xff] }
  0x69   : > { %886 = vmatprep.mubr.f32.mxu1 %v1510_v36 }
  0x6b   : > { %802 = vmatmul.mubr.f32.gmra.mrb[8].mxu0 %v382_v41 }
  0x6c   : > { %887 = vmatmul.mubr.f32.gmra.mrb[8].mxu1 %v384_v45  ;;  %806 = vmatprep.mubr.f32.mxu0 %v1507_v35 }
  0x6d   : > { %891 = vmatprep.mubr.f32.mxu1 %v1513_v37 }
  0x6f   : > { %807 = vmatmul.mubr.f32.gmra.mrb[10].mxu0 %v386_v42 }
  0x70   : > { %892 = vmatmul.mubr.f32.gmra.mrb[10].mxu1 %v388_v46  ;;  %1205 = vmatprep.mubr.msk.f32.mxu0 (!%p1181_p10), %vm1354_vm4, %v1355_v48 }
  0xd7   : > { %v927_v49 = vpop.permute.xlu0 (!%p1181_p10), %926 }
  0xdb   : > { %v934_v52 = vpop.permute.xlu0 (!%p1181_p10), %933 }
 0x116   : > { %v480_v60 = vpop.f32.mrb[0].mxu0 }
 0x117   : > { %v550_v62 = vpop.f32.mrb[0].mxu1  ;;  %v482_v63 = vpop.f32.mrb[1].mxu0 }
 0x118   : > { %v551_v0 = vadd.f32 %v550_v62, %v480_v60  ;;  %v552_v1 = vpop.f32.mrb[1].mxu1 }
 0x11a   : > { %v554_v2 = vadd.f32 %v551_v0, %v390_v61 }
 0x11c   : > { %556 = vst.msk [vmem:[#allocation2] sm:$0x3] %vm555_vm2, %v554_v2 }
 0x123   : > { %v914_v50 = vld [vmem:[#allocation2] sm:$0x3] (!%p1181_p10) }
 0x124   : > { %v929_v53 = vmul.f32 (!%p1181_p10), %v927_v49, %v914_v50  ;;  %v921_v0 = vadd.f32 (!%p1181_p10), %v1182_v55, %v914_v50 }
 0x126   : > { %v647_v3 = vpop.f32.mrb[2].mxu0  ;;  %v939_v1 = vmax.f32 (!%p1181_p10), %v921_v0, 0.0 }
 0x127   : > { %v717_v5 = vpop.f32.mrb[2].mxu1  ;;  %v649_v6 = vpop.f32.mrb[3].mxu0 }
 0x128   : > { %v718_v7 = vadd.f32 %v717_v5, %v647_v3  ;;  %v719_v8 = vpop.f32.mrb[3].mxu1  ;;  %v946_v5 = vmul.f32 (!%p1181_p10), %v1183_v57, %v939_v1 }
 0x12a   : > { %v721_v9 = vadd.f32 %v718_v7, %v557_v4  ;;  %v947_v7 = vsel (!%p1181_p10), %vm555_vm2, %v946_v5, 0.0 }
 0x12c   : > { %722 = vst.msk [vmem:[#allocation3] sm:$0x3] %vm555_vm2, %v721_v9  ;;  %v1184_v9 = vld [vmem:[#allocation5] ss:$0 sm:$0xff] (!%p1181_p10) }
 0x133   : > { %v922_v51 = vld [vmem:[#allocation3] sm:$0x3] (!%p1181_p10) }
 0x134   : > { %v936_v54 = vmul.f32 (!%p1181_p10), %v934_v52, %v922_v51  ;;  %v923_v60 = vadd.f32 (!%p1181_p10), %v1182_v55, %v922_v51 }
 0x136   : > { %v793_v10 = vpop.f32.mrb[4].mxu0  ;;  %v937_v56 = vadd.f32 (!%p1181_p10), %v936_v54, %v929_v53  ;;  %v957_v61 = vmax.f32 (!%p1181_p10), %v923_v60, 0.0 }
 0x137   : > { %v878_v12 = vpop.f32.mrb[4].mxu1  ;;  %v795_v13 = vpop.f32.mrb[5].mxu0 }
 0x138   : > { %v879_v14 = vadd.f32 %v878_v12, %v793_v10  ;;  %v880_v15 = vpop.f32.mrb[5].mxu1  ;;  %v938_v58 = vadd.f32 (!%p1181_p10), %v1182_v55, %v937_v56  ;;  %v958_v62 = vmul.f32 (!%p1181_p10), %v1183_v57, %v957_v61 }
 0x13a   : > { %v897_v16 = vadd.f32 %v879_v14, %v723_v11  ;;  %v798_v17 = vpop.f32.mrb[6].mxu0  ;;  %vm963_vm5 = vcmp.gt.f32.partialorder (!%p1181_p10), %v938_v58, 0.0  ;;  %v959_v63 = vsel (!%p1181_p10), %vm555_vm2, %v958_v62, 0.0 }
 0x13b   : > { %v883_v19 = vpop.f32.mrb[6].mxu1  ;;  %v800_v20 = vpop.f32.mrb[7].mxu0  ;;  %v964_v59 = vsel (!%p1181_p10), %vm963_vm5, %v1183_v57, 0.0  ;;  %960 = vadd.xlane.f32.xlu0 (!%p1181_p10), %v959_v63 }
 0x13c   : > { %902 = vst.msk [vmem:[#allocation4] sm:$0xff] %vm901_vm3, %v897_v16  ;;  %v884_v21 = vadd.f32 %v883_v19, %v798_v17  ;;  %v885_v22 = vpop.f32.mrb[7].mxu1 }
 0x13e   : > { %v898_v23 = vadd.f32 %v884_v21, %v724_v18  ;;  %v803_v24 = vpop.f32.mrb[8].mxu0 }
 0x13f   : > { %v888_v26 = vpop.f32.mrb[8].mxu1  ;;  %v805_v27 = vpop.f32.mrb[9].mxu0 }
 0x140   : > { %903 = vst.msk [vmem:[#allocation4 + $0x8] sm:$0xff] %vm901_vm3, %v898_v23  ;;  %v889_v28 = vadd.f32 %v888_v26, %v803_v24  ;;  %v890_v29 = vpop.f32.mrb[9].mxu1 }
 0x142   : > { %v899_v30 = vadd.f32 %v889_v28, %v725_v25  ;;  %v808_v31 = vpop.f32.mrb[10].mxu0  ;;  %909 = sbr.rel (%p1181_p10) target bundleno = 933 (0x3a5), region = 79 }
 0x143   : > { %v893_v33 = vpop.f32.mrb[10].mxu1  ;;  %v810_v34 = vpop.f32.mrb[11].mxu0  ;;  %v965_v41 = vld [vmem:[#allocation4] sm:$0xff] (!%p1181_p10) }
 0x144   : > { %904 = vst.msk [vmem:[#allocation4 + $0x10] sm:$0xff] %vm901_vm3, %v899_v30  ;;  %v894_v35 = vadd.f32 %v893_v33, %v808_v31  ;;  %v895_v36 = vpop.f32.mrb[11].mxu1 }
 0x146   : > { %v900_v37 = vadd.f32 %v894_v35, %v726_v32 }
 0x147   : > { %v966_v42 = vld [vmem:[#allocation4 + $0x8] sm:$0xff] (!%p1181_p10) }
 0x148   : > { %905 = vst.msk [vmem:[#allocation4 + $0x18] sm:$0xff] %vm901_vm3, %v900_v37  ;;  %v1257_v43 = vpack.c.bf16 (!%p1181_p10), %v966_v42, %v965_v41 }
 0x14a   : > { %1258 = vmatpush3.bf16.msra.mxu0 %v1257_v43 }
 0x14b   : > { %1259 = vmatprep.subr.bf16.mxu0 %v1353_v44  ;;  %v967_v45 = vld [vmem:[#allocation4 + $0x10] sm:$0xff] }
 0x14f   : > { %v968_v46 = vld [vmem:[#allocation4 + $0x18] sm:$0xff] }
 0x150   : > { %v1260_v47 = vpack.c.bf16 %v968_v46, %v967_v45 }
 0x152   : > { %1261 = vmatpush3.bf16.msra.mxu0 %v1260_v47 }
 0x155   : > { %1206 = vmatmul.mubr.msk.f32.vlgmr.msra.gmra.mrb[0].mxu0 %vm901_vm3, %v964_v59 }
 0x1c8   : > { %v961_v18 = vpop.xlane.xlu0 %960 }
 0x1c9   : > { %v962_v21 = vadd.f32 %v1184_v9, %v961_v18 }
 0x1cb   : > { %v1077_v23 = vsel %vm1055_vm6, %v962_v21, 0.0 }
 0x228   : > { %v1038_v2 = vpop.f32.mrb[0].mxu0 }
 0x229   : > { %v1207_v3 = vpop.f32.mrb[1].mxu0  ;;  %v1042_v4 = vmul.f32 %v1038_v2, %v964_v59 }
 0x22b   : > { %v1043_v6 = vsel %vm555_vm2, %v1042_v4, 0.0 }
 0x22c   : > { %1044 = vadd.xlane.f32.xlu1 %v1043_v6 }
 0x230   : > { %948 = vadd.xlane.f32.xlu1 %v947_v7 }
 0x2b9   : > { %v1045_v8 = vpop.xlane.xlu1 %1044 }
 0x2ba   : > { %1308 = vrsqrt.f32 %v1045_v8  ;;  %vm1048_vm7 = vcmp.eq.f32.partialorder %v1045_v8, inf  ;;  %v1051_v15 = vand.u32 2147483648, %v1045_v8  ;;  %vm1050_vm8 = vcmp.eq.f32.partialorder %v1045_v8, 0.0 }
 0x2bd   : > { %v949_v10 = vpop.xlane.xlu1 %948 }
 0x2be   : > { %v956_v11 = vadd.f32 %v1184_v9, %v949_v10 }
 0x2c0   : > { %v1067_v12 = vsel %vm1055_vm6, %v956_v11, 0.0 }
 0x2c1   : > { %1068 = vadd.xlane.f32.xlu1 %v1067_v12 }
 0x2c4   : > { %v1309_v13 = vpop.eup %1308 }
 0x2c5   : > { %v1047_v14 = vmul.f32 %v1309_v13, %v1045_v8 }
 0x2c7   : > { %v1049_v16 = vsel %vm1048_vm7, %v1045_v8, %v1047_v14 }
 0x2c8   : > { %v1052_v17 = vsel %vm1050_vm8, %v1051_v15, %v1049_v16 }
 0x2c9   : > { %v1186_v19 = vadd.f32 -1.0, %v1052_v17 }
 0x2cb   : > { %v1054_v20 = vmul.f32 %v1186_v19, %v1186_v19 }
 0x2cd   : > { %v1056_v22 = vsel %vm1055_vm6, %v1054_v20, 0.0 }
 0x2ce   : > { %1057 = vadd.xlane.f32.xlu1 %v1056_v22 }
 0x2d2   : > { %1078 = vadd.xlane.f32.xlu1 %v1077_v23 }
 0x34e   : > { %v1069_v24 = vpop.xlane.xlu1 %1068 }
 0x34f   : > { %v1070_v25 = vrot.slane %v1069_v24, 4 }
 0x351   : > { %v1071_v26 = vadd.f32 %v1070_v25, %v1069_v24 }
 0x353   : > { %v1072_v27 = vrot.slane %v1071_v26, 2 }
 0x355   : > { %v1073_v32 = vadd.f32 %v1072_v27, %v1071_v26 }
 0x357   : > { %v1074_v37 = vrot.slane %v1073_v32, 1 }
 0x359   : > { %v1075_v42 = vadd.f32 %v1074_v37, %v1073_v32 }
 0x35b   : > { %v1058_v28 = vpop.xlane.xlu1 %1057 }
 0x35c   : > { %v1059_v29 = vrot.slane %v1058_v28, 4 }
 0x35e   : > { %v1060_v30 = vadd.f32 %v1059_v29, %v1058_v28 }
 0x35f   : > { %v1079_v31 = vpop.xlane.xlu1 %1078 }
 0x360   : > { %v1061_v33 = vrot.slane %v1060_v30, 2  ;;  %v1080_v34 = vrot.slane %v1079_v31, 4 }
 0x362   : > { %v1081_v35 = vadd.f32 %v1080_v34, %v1079_v31  ;;  %v1062_v36 = vadd.f32 %v1061_v33, %v1060_v30 }
 0x364   : > { %v1082_v38 = vrot.slane %v1081_v35, 2  ;;  %v1063_v39 = vrot.slane %v1062_v36, 1 }
 0x366   : > { %v1083_v40 = vadd.f32 %v1082_v38, %v1081_v35  ;;  %v1064_v41 = vadd.f32 %v1063_v39, %v1062_v36 }
 0x368   : > { %1262 = vpush %v1064_v41  ;;  %v1084_v43 = vrot.slane %v1083_v40, 1 }
 0x369   : > { %1264 = vpush %v1075_v42 }
 0x36a   : > { %v1085_v44 = vadd.f32 %v1084_v43, %v1083_v40 }
 0x36c   : > { %1266 = vpush %v1085_v44 }
 0x399   : > { %s1263_s14 = spop %1262 }
 0x39a   : > { %s1066_s15 = smul.f32 0.5, %s1263_s14  ;;  %s1265_s16 = spop %1264 }
 0x39c   : > { %s1089_s19 = smul.f32 0.1, %s1066_s15 }
 0x39d   : > { %s1267_s17 = spop %1266 }
 0x39e   : > { %s1087_s18 = ssub.f32 %s1265_s16, %s1267_s17 }
 0x3a0   : > { %s1088_s20 = smul.f32 0.5, %s1087_s18 }
 0x3a2   : > { %s1090_s21 = sadd.f32 %s1089_s19, %s1088_s20 }
 0x3a4   : > { %1092 = sst [smem:[#allocation7]] %s1090_s21 }
 0x3a5 PF: > { %p1272_p11 = scmp.eq.s32.totalorder %s1416_s3, 1  ;;  %s1310_s24 = scalar_lea.hbm %s1590_s7, 16 }
 0x3a6   : > { %p1311_p12 = scmp.ne.s32.totalorder %s1590_s7, %s1310_s24  ;;  %p1316_p1 = scmp.lt.u32.totalorder %s1310_s24, %s1590_s7 }
 0x3a8   : > { %p1312_p13 = pnand %p1311_p12, %p1272_p11 }
 0x3aa   : > { %p1313_p0 = pneg %p1312_p13 }
 0x3ac   : > { %p1318_p2 = pnand %p1316_p1, %p1313_p0 }
 0x3ae   : > { %1321 = shalt.err (!%p1318_p2)
}
 0x3af   : > { %s1356_s8 = smov [#allocation7]  }
 0x3b0   : > { %1269 = dma.smem_to_hbm (%p1272_p11), %s1356_s8, 16, %s1590_s7, [#allocation8]  }
 0x3b1   : > { %1335 = dma.done.wait (%p1272_p11), [#allocation8], 16  }
 0x3b2   : > { %1337 = vsyncadd (%p1272_p11), [#allocation8], 4294967280 }
 0x3b3   : > { %1106 = sfence }
 0x3b4 PF: > { %p17_p3 = scmp.ge.s32.totalorder %s1419_s29, 4   ;;  %s1591_s26 = smov %s1344_s27 }
 0x3b5   : > { %s1592_s27 = smov %s1428_s9  ;;  %s1593_s28 = smov %s1419_s29 }
 0x3b6   :  { %19 = sbr.rel (!%p17_p3) target bundleno = 5 (0x5), region = 118 }
 0x3bd   :  { %1112 = vsyncpa [#allocation8], 1 }
 0x3be   :  { %1114 = vsyncpa [#allocation8 + $0x1], 1 }

</bundles_post_ra>
